<compile_context>
chip_gen: v7x
topology: tpu7x:2x2x1
jax: 0.10.0
libtpu: 0.0.40
codegen_flags: <defaults>
</compile_context>

<pallas_src>
import jax
import jax.numpy as jnp
from jax.experimental import pallas as pl
from jax.experimental.pallas import tpu as pltpu

# Only bother splitting the DMA for big tensors; small copies are pure
# launch-overhead dominated and a single DMA is already optimal.
_CHUNK_THRESHOLD_BYTES = 32 * 1024 * 1024
_MAX_CHUNKS = 8


def _single_dma_kernel(x_hbm_ref, o_hbm_ref, sem):
    # Entire forward pass of Identity: o = x, as one HBM -> HBM DMA.
    copy = pltpu.make_async_copy(x_hbm_ref, o_hbm_ref, sem)
    copy.start()
    copy.wait()


def _make_chunked_dma_kernel(row_splits):
    # row_splits: static tuple of (start, size) pairs covering the leading
    # axis. Start all DMAs (multiple outstanding), then wait on all of them.
    def kernel(x_hbm_ref, o_hbm_ref, sem):
        copies = []
        for i, (start, size) in enumerate(row_splits):
            cp = pltpu.make_async_copy(
                x_hbm_ref.at[pl.ds(start, size)],
                o_hbm_ref.at[pl.ds(start, size)],
                sem.at[i],
            )
            cp.start()
            copies.append(cp)
        for cp in copies:
            cp.wait()

    return kernel


def identity(x: jax.Array, *, copy: bool = True) -> jax.Array:
    """Pallas identity: returns an array equal to x (same shape, same dtype).

    copy=False returns x itself (zero bytes moved) — use when the caller does
    not need a distinct output buffer.
    """
    if not copy or x.size == 0:
        return x

    nbytes = x.size * x.dtype.itemsize
    cost = pl.CostEstimate(flops=0, transcendentals=0, bytes_accessed=2 * nbytes)

    leading = x.shape[0] if x.ndim > 0 else 1
    if nbytes >= _CHUNK_THRESHOLD_BYTES and x.ndim > 0 and leading >= 2:
        num_chunks = min(_MAX_CHUNKS, leading)
        base, rem = divmod(leading, num_chunks)
        splits, start = [], 0
        for i in range(num_chunks):
            size = base + (1 if i < rem else 0)
            splits.append((start, size))
            start += size
        kernel = _make_chunked_dma_kernel(tuple(splits))
        sem_shape = pltpu.SemaphoreType.DMA((num_chunks,))
    else:
        kernel = _single_dma_kernel
        sem_shape = pltpu.SemaphoreType.DMA(())

    return pl.pallas_call(
        kernel,
        out_shape=jax.ShapeDtypeStruct(x.shape, x.dtype),
        in_specs=[pl.BlockSpec(memory_space=pl.ANY)],
        out_specs=pl.BlockSpec(memory_space=pl.ANY),
        scratch_shapes=[sem_shape],
        cost_estimate=cost,
    )(x)


if __name__ == "__main__":
    key = jax.random.PRNGKey(0)
    # Small NCHW input consistent with typical usage of Identity in fid.py.
    x = jax.random.normal(key, (2, 4, 16, 16), dtype=jnp.float32)

    # Real-copy path (exercises the Pallas DMA kernel).
    y = identity(x)
    y = jax.block_until_ready(y)

    assert y.shape == x.shape and y.dtype == x.dtype
    assert bool(jnp.all(y == x))

    # Zero-byte fast path ("the best identity kernel is no kernel").
    z = identity(x, copy=False)
    assert z is x

    print("KERNEL_OK")
</pallas_src>

<mosaic_0001>
module attributes {stable_mosaic.version = 11 : i64} {
  func.func @_single_dma_kernel(%arg0: memref<2x4x16x16xf32, #tpu.memory_space<any>>, %arg1: memref<2x4x16x16xf32, #tpu.memory_space<any>>, %arg2: memref<!tpu.dma_semaphore, #tpu.memory_space<semaphore_mem>>) attributes {dimension_semantics = [], scalar_prefetch = 0 : i64, scratch_operands = 1 : i64, tpu.core_type = #tpu.core_type<tc>} {
    tpu.enqueue_dma source(%arg0 : memref<2x4x16x16xf32, #tpu.memory_space<any>>) target(%arg1 : memref<2x4x16x16xf32, #tpu.memory_space<any>>) target_semaphore(%arg2 : memref<!tpu.dma_semaphore, #tpu.memory_space<semaphore_mem>>)
    tpu.wait_dma2 semaphore(%arg2 : memref<!tpu.dma_semaphore, #tpu.memory_space<semaphore_mem>>) src(%arg0 : memref<2x4x16x16xf32, #tpu.memory_space<any>>) dst(%arg1 : memref<2x4x16x16xf32, #tpu.memory_space<any>>)
    return
  }
}

</mosaic_0001>

<bundles_post_ra>
// kernel: tpu_custom_call.1
= control target key start
LH: loop header
LB: loop body
LE: loop exit
PB: predicated region body
PF: predicated region fallthrough
CT: control target
= control target key end

     0   :  { %s36_s6 = smov [#allocation2]   ;;  %s37_s7 = smov [#allocation3]   ;;  %s55_s0 = inlined_call_operand.hbm [shape: f32[2,4,16,16], index: 0, kind: input, shape index: {}]   ;;  %s56_s1 = inlined_call_operand.hbm [shape: f32[2,4,16,16], index: 1, kind: output, shape index: {}]  }
   0x1   :  { %s38_s8 = smov 0  }
   0x2   :  { %18 = dma.general %s55_s0, 2048, %s56_s1, %s36_s6, %s37_s7, [#allocation4], %s38_s8, 0  }
   0x3   :  { %34 = dma.done.wait [#allocation2], 2048 }
   0x4   :  { %35 = vsyncadd [#allocation2], 4294965248 }
   0x5   :  { %24 = vsyncmov [#allocation2] }
   0x8   :  { %s25_s13 = vpop.sfrf %24 }
   0x9   :  { %p30_p0 = scmp.ne.s32.totalorder %s25_s13, 0 }
   0xb   :  { %29 = shalt.err (%p30_p0)  }

</bundles_post_ra>
